<compile_context>
chip_gen: v5e
topology: v5e:2x2
jax: 0.10.0
libtpu: 0.0.40
codegen_flags: <defaults>
</compile_context>

<pallas_src>
import jax
import jax.numpy as jnp
from jax.experimental import pallas as pl
from jax.experimental.pallas import tpu as pltpu


HIDDEN = 64
BATCH_TILE = 256  # multiple of 256 (v6e/v7x MXU) and of 128 (v5e MXU)


def _dqn_kernel(x_ref, w1_ref, b1_ref, w2_ref, b2_ref, o_ref):
    # x_ref : (TB, N*D)   w1_ref: (N*D, 64)   b1_ref: (1, 64)
    # w2_ref: (64, N)     b2_ref: (1, N)      o_ref : (TB, N)
    x = x_ref[...]
    # matmul in the input dtype (f32 or bf16), accumulate in f32
    h = jnp.dot(x, w1_ref[...], preferred_element_type=jnp.float32) + b1_ref[...]
    h = jnp.maximum(h, 0.0)                       # bias + ReLU stay f32
    h = h.astype(w2_ref.dtype)                    # back to matmul dtype
    q = jnp.dot(h, w2_ref[...], preferred_element_type=jnp.float32) + b2_ref[...]
    o_ref[...] = q.astype(o_ref.dtype)


def _cost_estimate(B, d_in, n_out, mm_itemsize):
    flops = 2 * B * (d_in * HIDDEN + HIDDEN * n_out)
    bytes_accessed = (
        mm_itemsize * (B * d_in + d_in * HIDDEN + HIDDEN * n_out)  # x, w1, w2
        + 4 * (HIDDEN + n_out)                                     # biases (f32)
        + 4 * (B * n_out)                                          # output (f32)
    )
    return pl.CostEstimate(flops=flops, transcendentals=0,
                           bytes_accessed=bytes_accessed)


def geant2_dqn_forward(x, adj, params, *, matmul_dtype=None):
    """x: (B, number_of_node, dim_input); adj is accepted but unused (as in PyTorch).

    matmul_dtype: optionally jnp.bfloat16 to halve HBM traffic for x/w on v6e/v7x
    (bias add / ReLU / output stay f32).  Default keeps the parameter dtype.
    """
    del adj  # unused in the reference forward
    w1, b1, w2, b2 = params["w1"], params["b1"], params["w2"], params["b2"]
    B = x.shape[0]
    d_in = w1.shape[0]
    n_out = w2.shape[1]
    out_dtype = jnp.float32

    x_flat = x.reshape(B, d_in)  # same as torch .view(B, -1)
    if matmul_dtype is not None:
        x_flat = x_flat.astype(matmul_dtype)
        w1 = w1.astype(matmul_dtype)
        w2 = w2.astype(matmul_dtype)

    b1_2d = b1.reshape(1, HIDDEN).astype(jnp.float32)
    b2_2d = b2.reshape(1, n_out).astype(jnp.float32)

    ce = _cost_estimate(B, d_in, n_out, jnp.dtype(x_flat.dtype).itemsize)

    if B <= BATCH_TILE:
        # ---- small-batch path: no grid, whole-array VMEM blocks -------------
        vmem = pl.BlockSpec(memory_space=pltpu.MemorySpace.VMEM)
        return pl.pallas_call(
            _dqn_kernel,
            out_shape=jax.ShapeDtypeStruct((B, n_out), out_dtype),
            in_specs=[vmem, vmem, vmem, vmem, vmem],
            out_specs=vmem,
            cost_estimate=ce,
        )(x_flat, w1, b1_2d, w2, b2_2d)

    # ---- large-batch path: batch-tiled grid, VMEM-resident weights ----------
    tb = BATCH_TILE
    n_tiles = pl.cdiv(B, tb)
    b_pad = n_tiles * tb
    if b_pad != B:
        x_flat = jnp.pad(x_flat, ((0, b_pad - B), (0, 0)))

    out = pl.pallas_call(
        _dqn_kernel,
        out_shape=jax.ShapeDtypeStruct((b_pad, n_out), out_dtype),
        grid=(n_tiles,),
        in_specs=[
            pl.BlockSpec((tb, d_in), lambda i: (i, 0)),        # streamed x
            pl.BlockSpec((d_in, HIDDEN), lambda i: (0, 0)),    # resident w1
            pl.BlockSpec((1, HIDDEN), lambda i: (0, 0)),       # resident b1
            pl.BlockSpec((HIDDEN, n_out), lambda i: (0, 0)),   # resident w2
            pl.BlockSpec((1, n_out), lambda i: (0, 0)),        # resident b2
        ],
        out_specs=pl.BlockSpec((tb, n_out), lambda i: (i, 0)),
        compiler_params=pltpu.CompilerParams(
            dimension_semantics=("parallel",),  # shard batch tiles across TCs (v7x)
        ),
        cost_estimate=ce,
    )(x_flat, w1, b1_2d, w2, b2_2d)
    return out[:B]


def init_params(key, number_of_node, dim_input):
    """Deterministic init mimicking nn.Linear defaults (uniform +/- 1/sqrt(fan_in))."""
    d_in = number_of_node * dim_input
    k1, k2, k3, k4 = jax.random.split(key, 4)
    bound1 = 1.0 / jnp.sqrt(d_in)
    bound2 = 1.0 / jnp.sqrt(HIDDEN)
    return {
        # stored as (in_features, out_features), i.e. torch weight transposed
        "w1": jax.random.uniform(k1, (d_in, HIDDEN), jnp.float32, -bound1, bound1),
        "b1": jax.random.uniform(k2, (HIDDEN,), jnp.float32, -bound1, bound1),
        "w2": jax.random.uniform(k3, (HIDDEN, number_of_node), jnp.float32, -bound2, bound2),
        "b2": jax.random.uniform(k4, (number_of_node,), jnp.float32, -bound2, bound2),
    }


def reference_forward(x, params):
    B = x.shape[0]
    x_flat = x.reshape(B, -1)
    h = jnp.maximum(x_flat @ params["w1"] + params["b1"], 0.0)
    return h @ params["w2"] + params["b2"]


if __name__ == "__main__":
    number_of_node = 8
    dim_input = 4
    batch = 2

    key = jax.random.PRNGKey(0)
    kx, ka, kp, kb = jax.random.split(key, 4)

    x = jax.random.normal(kx, (batch, number_of_node, dim_input), jnp.float32)
    adj = jax.random.normal(ka, (number_of_node, number_of_node), jnp.float32)
    params = init_params(kp, number_of_node, dim_input)

    # Small-batch (gridless) path.
    q = geant2_dqn_forward(x, adj, params)
    q = jax.block_until_ready(q)
    q_ref = reference_forward(x, params)
    assert q.shape == (batch, number_of_node)
    assert jnp.allclose(q, q_ref, atol=1e-5, rtol=1e-5)

    # Large-batch (tiled, weight-resident) path, including tail padding.
    big_batch = 300
    xb = jax.random.normal(kb, (big_batch, number_of_node, dim_input), jnp.float32)
    qb = geant2_dqn_forward(xb, adj, params)
    qb = jax.block_until_ready(qb)
    qb_ref = reference_forward(xb, params)
    assert qb.shape == (big_batch, number_of_node)
    assert jnp.allclose(qb, qb_ref, atol=1e-5, rtol=1e-5)

    print("KERNEL_OK")
</pallas_src>

<mosaic_0001>
module attributes {stable_mosaic.version = 11 : i64} {
  func.func @_dqn_kernel(%arg0: memref<2x32xf32, #tpu.memory_space<vmem>>, %arg1: memref<32x64xf32, #tpu.memory_space<vmem>>, %arg2: memref<1x64xf32, #tpu.memory_space<vmem>>, %arg3: memref<64x8xf32, #tpu.memory_space<vmem>>, %arg4: memref<1x8xf32, #tpu.memory_space<vmem>>, %arg5: memref<2x8xf32, #tpu.memory_space<vmem>>) attributes {dimension_semantics = [], scalar_prefetch = 0 : i64, scratch_operands = 0 : i64, tpu.core_type = #tpu.core_type<tc>} {
    %c0 = arith.constant 0 : index
    %c0_0 = arith.constant 0 : index
    %0 = vector.load %arg0[%c0, %c0_0] : memref<2x32xf32, #tpu.memory_space<vmem>>, vector<2x32xf32>
    %c0_1 = arith.constant 0 : index
    %c0_2 = arith.constant 0 : index
    %1 = vector.load %arg1[%c0_1, %c0_2] : memref<32x64xf32, #tpu.memory_space<vmem>>, vector<32x64xf32>
    %cst = arith.constant dense<0.000000e+00> : vector<2x64xf32>
    %2 = tpu.matmul %0, %1, %cst {dimension_numbers = #tpu.dot_dimension_numbers<[1], [0], [0], [1], [0, 0, 1, 1], [], []>} : vector<2x32xf32>, vector<32x64xf32>, vector<2x64xf32> -> vector<2x64xf32>
    %c0_3 = arith.constant 0 : index
    %c0_4 = arith.constant 0 : index
    %3 = vector.load %arg2[%c0_3, %c0_4] : memref<1x64xf32, #tpu.memory_space<vmem>>, vector<1x64xf32>
    %4 = vector.broadcast %3 : vector<1x64xf32> to vector<2x64xf32>
    %5 = arith.addf %2, %4 : vector<2x64xf32>
    %cst_5 = arith.constant 0.000000e+00 : f32
    %6 = vector.broadcast %cst_5 : f32 to vector<2x64xf32>
    %7 = arith.maximumf %5, %6 : vector<2x64xf32>
    %c0_6 = arith.constant 0 : index
    %c0_7 = arith.constant 0 : index
    %8 = vector.load %arg3[%c0_6, %c0_7] : memref<64x8xf32, #tpu.memory_space<vmem>>, vector<64x8xf32>
    %cst_8 = arith.constant dense<0.000000e+00> : vector<2x8xf32>
    %9 = tpu.matmul %7, %8, %cst_8 {dimension_numbers = #tpu.dot_dimension_numbers<[1], [0], [0], [1], [0, 0, 1, 1], [], []>} : vector<2x64xf32>, vector<64x8xf32>, vector<2x8xf32> -> vector<2x8xf32>
    %c0_9 = arith.constant 0 : index
    %c0_10 = arith.constant 0 : index
    %10 = vector.load %arg4[%c0_9, %c0_10] : memref<1x8xf32, #tpu.memory_space<vmem>>, vector<1x8xf32>
    %11 = vector.broadcast %10 : vector<1x8xf32> to vector<2x8xf32>
    %12 = arith.addf %9, %11 : vector<2x8xf32>
    %c0_11 = arith.constant 0 : index
    %c0_12 = arith.constant 0 : index
    %13 = vector.load %arg5[%c0_11, %c0_12] : memref<2x8xf32, #tpu.memory_space<vmem>>, vector<2x8xf32>
    tpu.vector_store %arg5[%c0_11, %c0_12], %12 {strides = array<i32>} : memref<2x8xf32, #tpu.memory_space<vmem>>, vector<2x8xf32>,
    return
  }
}

</mosaic_0001>

<bundles_post_ra>
// kernel: tpu_custom_call.1
= control target key start
LH: loop header
LB: loop body
LE: loop exit
PB: predicated region body
PF: predicated region fallthrough
CT: control target
= control target key end

     0   :  { %s219_s0 = inlined_call_operand.vmem [shape: f32[2,32], index: 0, kind: input, shape index: {}]   ;;  %s220_s1 = inlined_call_operand.vmem [shape: f32[32,64], index: 1, kind: input, shape index: {}]   ;;  %s221_s2 = inlined_call_operand.vmem [shape: f32[1,64], index: 2, kind: input, shape index: {}]   ;;  %s222_s3 = inlined_call_operand.vmem [shape: f32[64,8], index: 3, kind: input, shape index: {}]   ;;  %s223_s4 = inlined_call_operand.vmem [shape: f32[1,8], index: 4, kind: input, shape index: {}]   ;;  %s224_s5 = inlined_call_operand.hbm [shape: f32[2,8], index: 5, kind: output, shape index: {}]  }
   0x1   :  { %v25_v0 = vld [vmem:[%s220_s1 + $0x18] sm:$0xff]  ;;  %v24_v1 = vld [vmem:[%s220_s1 + $0x10] sm:$0xff]  ;;  %v23_v3 = vld [vmem:[%s220_s1 + $0x8] sm:$0xff] }
   0x2   :  { %46 = vmatpush.msra.mxu0 %v25_v0  ;;  %v62_v2 = vld [vmem:[%s222_s3 + $0x38] sm:$0xff]  ;;  %v61_v4 = vld [vmem:[%s222_s3 + $0x30] sm:$0xff]  ;;  %v60_v5 = vld [vmem:[%s222_s3 + $0x28] sm:$0xff] }
   0x3   :  { %79 = vmatpush.msra.mxu1 %v62_v2  ;;  %v22_v6 = vld [vmem:[%s220_s1] sm:$0xff] }
   0x4   :  { %47 = vmatpush.msra.mxu0 %v24_v1 }
   0x5   :  { %80 = vmatpush.msra.mxu1 %v61_v4 }
   0x6   :  { %10 = vsyncpa [#allocation3], 0  ;;  %48 = vmatpush.msra.mxu0 %v23_v3  ;;  %v21_v7 = vld [vmem:[%s219_s0] sm:$0x3]  ;;  %vm30_vm0 = vcmask 261120   ;;  %v58_v9 = vld [vmem:[%s222_s3 + $0x18] sm:$0xff] }
   0x7   :  { %v59_v8 = vld [vmem:[%s222_s3 + $0x20] sm:$0xff]  ;;  %81 = vmatpush.msra.mxu1 %v60_v5  ;;  %v57_v10 = vld [vmem:[%s222_s3 + $0x10] sm:$0xff]  ;;  %v56_v11 = vld [vmem:[%s222_s3 + $0x8] sm:$0xff]  ;;  %vm67_vm1 = vcmask 523264   ;;  %s140_s21 = smov [#allocation2]   ;;  %vm91_vm2 = vcmask 58368  }
   0x8   :  { %49 = vmatpush.msra.mxu0 %v22_v6  ;;  %v55_v12 = vld [vmem:[%s222_s3] sm:$0xff]  ;;  %s98_s22 = sshll.u32 %s140_s21, 4  ;;  %s100_s3 = sshll.u32 %s224_s5, 4  ;;  %s99_s22 = int_to_ptr.vmem [resolvable:$true] %s98_s22  ;;  %s101_s3 = int_to_ptr.hbm [resolvable:$true] %s100_s3 }
   0x9   :  { %109 = vmatmul.msk.f32.vlgmr.msra.gmra.mxu0 %vm30_vm0, %v21_v7  ;;  %82 = vmatpush.msra.mxu1 %v59_v8  ;;  %v112_v13 = vld [vmem:[%s221_s2] ss:$0 sm:$0xff] }
   0xa   :  { %v113_v17 = vld [vmem:[%s223_s4] ss:$0 sm:$0xff] }
   0xb   :  { %83 = vmatpush.msra.mxu1 %v58_v9 }
   0xd   :  { %84 = vmatpush.msra.mxu1 %v57_v10 }
   0xf   :  { %85 = vmatpush.msra.mxu1 %v56_v11 }
  0x11   :  { %86 = vmatpush.msra.mxu1 %v55_v12 }
  0x86   :  { %v51_v14 = vpop.f32.mrf.mxu0 }
  0x87   :  { %v52_v15 = vadd.f32 %v112_v13, %v51_v14 }
  0x89   :  { %v54_v16 = vmax.f32 %v52_v15, 0.0 }
  0x8b   :  { %110 = vmatmul.msk.f32.vlgmr.msra.gmra.mxu1 %vm67_vm1, %v54_v16 }
 0x108   :  { %v88_v18 = vpop.f32.mrf.mxu1 }
 0x109   :  { %v89_v19 = vadd.f32 %v113_v17, %v88_v18 }
 0x10b   :  { %92 = vst.msk [vmem:[#allocation2] sm:$0x3] %vm91_vm2, %v89_v19 }
 0x10c   :  { %103 = dma.vmem_to_hbm [thread:$0]  %s99_s22, 32, %s101_s3, [#allocation3]  }
 0x10d   :  { %138 = dma.done.wait [#allocation3], 32  }
 0x10e   :  { %139 = vsyncadd [#allocation3], 4294967264 }
 0x10f   :  { %108 = vsyncpa [#allocation3], 1 }

</bundles_post_ra>
